<compile_context>
chip_gen: v5e
topology: v5e:2x2
jax: 0.10.0
libtpu: 0.0.40
codegen_flags: <defaults>
</compile_context>

<pallas_src>
import jax
import jax.numpy as jnp
from jax import lax
from jax.experimental import pallas as pl
from jax.experimental.pallas import tpu as pltpu


_VMEM_LIMIT = 48 * 1024 * 1024   # explicit scoped-VMEM budget (fits v7x's 64 MiB)


def _round_up(x, m):
    return (x + m - 1) // m * m


def _pick_tile(dim, pref, align):
    """Largest tile <= pref that is a multiple of `align` and divides `dim`."""
    t = max(align, (min(pref, dim) // align) * align)
    while dim % t:
        t -= align
    return t


# ----------------------------------------------------------------------------
# Kernel 1: generic tiled matmul + bias  (out = x @ w + b), bf16 in / f32 acc.
# Used for both the batched input projection and the batched output projection.
# ----------------------------------------------------------------------------
def _matmul_bias_kernel(x_ref, w_ref, b_ref, o_ref, acc_ref):
    @pl.when(pl.program_id(2) == 0)
    def _():
        acc_ref[...] = jnp.zeros_like(acc_ref)

    acc_ref[...] += jnp.dot(x_ref[...], w_ref[...],
                            preferred_element_type=jnp.float32)

    @pl.when(pl.program_id(2) == pl.num_programs(2) - 1)
    def _():
        # Bias folded here: added once per output tile, never per timestep.
        o_ref[...] = (acc_ref[...] + b_ref[...]).astype(o_ref.dtype)


def matmul_bias(x, w, b, *, out_dtype=jnp.float32, tm=256, tk=512, tn=512):
    """x: (M, K) @ w: (K, N) + b: (1, N).  Requires M % 8 == 0, K/N % 128 == 0."""
    M, K = x.shape
    _, N = w.shape
    assert M % 8 == 0 and K % 128 == 0 and N % 128 == 0, (M, K, N)
    tm = _pick_tile(M, tm, 8)
    tk = _pick_tile(K, tk, 128)
    # NOTE(v7x): with only 64 MiB VMEM, use a smaller `tn` (V tile) at real LM
    # sizes (H~1k, V~32k); at scale also mark the loop-invariant weight specs
    # pipeline_mode=pl.Buffered(1) to drop their double-buffered VMEM copy.
    tn = _pick_tile(N, tn, 128)

    grid = (M // tm, N // tn, K // tk)
    return pl.pallas_call(
        _matmul_bias_kernel,
        out_shape=jax.ShapeDtypeStruct((M, N), out_dtype),
        grid_spec=pltpu.PrefetchScalarGridSpec(
            num_scalar_prefetch=0,
            grid=grid,
            in_specs=[
                pl.BlockSpec((tm, tk), lambda i, j, k: (i, k)),
                pl.BlockSpec((tk, tn), lambda i, j, k: (k, j)),
                pl.BlockSpec((1, tn), lambda i, j, k: (0, j)),
            ],
            out_specs=pl.BlockSpec((tm, tn), lambda i, j, k: (i, j)),
            scratch_shapes=[pltpu.VMEM((tm, tn), jnp.float32)],
        ),
        compiler_params=pltpu.CompilerParams(
            # "parallel" M/N axes -> the batched projections can use both
            # TensorCores on v7x; only the K axis is a reduction.
            dimension_semantics=("parallel", "parallel", "arbitrary"),
            vmem_limit_bytes=_VMEM_LIMIT,
        ),
    )(x, w, b)


# ----------------------------------------------------------------------------
# Kernel 2: serial recurrence.  Each grid step consumes a (Tc, B, H) block of
# the precomputed input projection, runs an unrolled Tc-step loop
#     h_t = tanh(pre_x_t + h_{t-1} @ W_hh)
# with the hidden state carried in VMEM scratch, and emits per-step hidden
# states (bf16, for the later batched output projection) plus the final state.
# ----------------------------------------------------------------------------
def _recurrence_kernel(pre_ref, h0_ref, whh_ref, h_all_ref, hT_ref, h_scr):
    @pl.when(pl.program_id(0) == 0)
    def _():
        h_scr[...] = h0_ref[...]

    whh = whh_ref[...]                       # (H, H) bf16, loop-invariant
    tc = pre_ref.shape[0]

    def step(t, h):
        pre = pre_ref[t]                     # (B, H) f32
        h_new = jnp.tanh(
            pre + jnp.dot(h.astype(jnp.bfloat16), whh,
                          preferred_element_type=jnp.float32))
        h_all_ref[t] = h_new.astype(h_all_ref.dtype)
        return h_new

    h_final = lax.fori_loop(0, tc, step, h_scr[...], unroll=True)
    h_scr[...] = h_final
    hT_ref[...] = h_final                    # out_spec is constant -> resident


def run_recurrence(pre_x, h0, w_hh, *, max_tc=32):
    T, B, H = pre_x.shape
    tc = min(T, max_tc)
    while T % tc:                            # Tc must divide T
        tc -= 1

    return pl.pallas_call(
        _recurrence_kernel,
        out_shape=(
            jax.ShapeDtypeStruct((T, B, H), jnp.bfloat16),  # per-step hidden
            jax.ShapeDtypeStruct((B, H), jnp.float32),      # final state
        ),
        grid_spec=pltpu.PrefetchScalarGridSpec(
            num_scalar_prefetch=0,
            grid=(T // tc,),
            in_specs=[
                pl.BlockSpec((tc, B, H), lambda i: (i, 0, 0)),   # pre_x block
                pl.BlockSpec((B, H), lambda i: (0, 0)),          # h0
                pl.BlockSpec((H, H), lambda i: (0, 0)),          # W_hh
            ],
            out_specs=[
                pl.BlockSpec((tc, B, H), lambda i: (i, 0, 0)),   # h_all
                pl.BlockSpec((B, H), lambda i: (0, 0)),          # final state
            ],
            scratch_shapes=[pltpu.VMEM((B, H), jnp.float32)],
        ),
        compiler_params=pltpu.CompilerParams(
            dimension_semantics=("arbitrary",),   # strictly sequential over T
            vmem_limit_bytes=_VMEM_LIMIT,
        ),
    )(pre_x, h0, w_hh)


# ----------------------------------------------------------------------------
# Synthetic wrapped LM module (deterministic init in-script).  Parameters are
# stored padded to hardware-friendly shapes; the zero padding keeps the math
# identical to the unpadded model.
# ----------------------------------------------------------------------------
class SimpleRNNLM:
    def __init__(self, vocab_size, emb_size, hidden_size, key):
        self.vocab_size = vocab_size
        self.emb_size = emb_size
        self.hidden_size = hidden_size
        self.ep = _round_up(emb_size, 128)
        self.hp = _round_up(hidden_size, 128)
        self.vp = _round_up(vocab_size, 128)
        self.logits_dtype = jnp.float32   # set to bf16 to halve the logits HBM write

        k_emb, k_xh, k_hh, k_ho = jax.random.split(key, 4)
        s = 0.1
        emb = s * jax.random.normal(k_emb, (vocab_size, emb_size), jnp.float32)
        w_xh = s * jax.random.normal(k_xh, (emb_size, hidden_size), jnp.float32)
        w_hh = s * jax.random.normal(k_hh, (hidden_size, hidden_size), jnp.float32)
        w_ho = s * jax.random.normal(k_ho, (hidden_size, vocab_size), jnp.float32)

        def pad2(a, r, c):
            return jnp.pad(a, ((0, r - a.shape[0]), (0, c - a.shape[1])))

        # bf16 weights feed the MXU; accumulation stays f32 inside the kernels.
        self.embedding = pad2(emb, vocab_size, self.ep).astype(jnp.bfloat16)
        self.w_xh = pad2(w_xh, self.ep, self.hp).astype(jnp.bfloat16)
        self.w_hh = pad2(w_hh, self.hp, self.hp).astype(jnp.bfloat16)
        self.w_ho = pad2(w_ho, self.hp, self.vp).astype(jnp.bfloat16)
        self.b_h = jnp.zeros((1, self.hp), jnp.float32)
        self.b_o = jnp.zeros((1, self.vp), jnp.float32)

    def __call__(self, ys, state=None, is_eval=False, n_caches=0, ylens=[],
                 predict_last=False):
        B, T = ys.shape
        H, Hp, V, Vp, Ep = (self.hidden_size, self.hp, self.vocab_size,
                            self.vp, self.ep)
        Bp = _round_up(B, 8)

        if state is None:
            state_p = jnp.zeros((Bp, Hp), jnp.float32)
        else:
            state_p = jnp.pad(state.astype(jnp.float32),
                              ((0, Bp - B), (0, Hp - H)))

        # Embedding gather straight into time-major layout (no transpose /
        # extra HBM round trip of the embedded activations).
        # TODO(synk): fuse the gather into the projection kernel via scalar
        # prefetch + in-kernel DMA gather instead of jnp.take.
        ys_p = jnp.pad(ys, ((0, Bp - B), (0, 0)))
        x_tbe = jnp.take(self.embedding, ys_p.T, axis=0)          # (T, Bp, Ep) bf16

        # Phase 1 (parallel): batched input projection, b_h folded in.
        pre_x = matmul_bias(x_tbe.reshape(T * Bp, Ep), self.w_xh, self.b_h,
                            out_dtype=jnp.float32).reshape(T, Bp, Hp)

        # Phase 2 (sequential): recurrence only does h @ W_hh + pre_x.
        h_all, hT = run_recurrence(pre_x, state_p, self.w_hh)

        # Phase 3 (parallel): batched output projection, b_o folded in.
        if predict_last:
            # Skip the vocabulary projection for all but the last timestep.
            logits_p = matmul_bias(hT.astype(jnp.bfloat16), self.w_ho, self.b_o,
                                   out_dtype=self.logits_dtype)   # (Bp, Vp)
            logits = logits_p[:B, :V][:, None, :]                 # (B, 1, V)
        else:
            logits_p = matmul_bias(h_all.reshape(T * Bp, Hp), self.w_ho,
                                   self.b_o, out_dtype=self.logits_dtype)
            logits = logits_p.reshape(T, Bp, Vp)[:, :B, :V].transpose(1, 0, 2)

        new_state = hT[:B, :H]
        # is_eval: synthetic model has no dropout, so eval == train path.
        # TODO(synk): n_caches / ylens (neural cache pointer mechanism) are not
        # implemented by this synthetic LM.
        return logits, new_state


# ----------------------------------------------------------------------------
# The actual module under test: pure delegation wrapper (matches PyTorch
# CPUWrapperLM.forward semantics exactly).
# ----------------------------------------------------------------------------
class CPUWrapperLM:
    def __init__(self, model):
        self.module = model

    def __call__(self, ys, state=None, is_eval=False, n_caches=0, ylens=[],
                 predict_last=False):
        return self.module(ys, state, is_eval, n_caches, ylens, predict_last)


# ----------------------------------------------------------------------------
# Pure-JAX reference (f32 math on the same bf16-quantized weights).
# ----------------------------------------------------------------------------
def _reference_forward(lm, ys, state):
    B, T = ys.shape
    V, E, H = lm.vocab_size, lm.emb_size, lm.hidden_size
    emb = lm.embedding[:, :E].astype(jnp.float32)
    w_xh = lm.w_xh[:E, :H].astype(jnp.float32)
    w_hh = lm.w_hh[:H, :H].astype(jnp.float32)
    w_ho = lm.w_ho[:H, :V].astype(jnp.float32)
    h = state if state is not None else jnp.zeros((B, H), jnp.float32)
    x = jnp.take(emb, ys, axis=0)                                 # (B, T, E)
    outs = []
    for t in range(T):
        h = jnp.tanh(x[:, t] @ w_xh + h @ w_hh)
        outs.append(h @ w_ho)
    return jnp.stack(outs, axis=1), h


if __name__ == "__main__":
    key = jax.random.PRNGKey(0)
    k_param, k_tok = jax.random.split(key)

    B, T = 2, 8
    VOCAB, EMB, HID = 64, 32, 32

    lm = SimpleRNNLM(VOCAB, EMB, HID, k_param)
    wrapper = CPUWrapperLM(lm)

    ys = jax.random.randint(k_tok, (B, T), 0, VOCAB, dtype=jnp.int32)

    logits, state = wrapper(ys, state=None, is_eval=True)
    jax.block_until_ready((logits, state))
    assert logits.shape == (B, T, VOCAB), logits.shape
    assert state.shape == (B, HID), state.shape

    ref_logits, ref_state = _reference_forward(lm, ys, None)
    assert float(jnp.max(jnp.abs(logits - ref_logits))) < 2e-2
    assert float(jnp.max(jnp.abs(state - ref_state))) < 2e-2

    # predict_last path (projects only the final hidden state)
    logits_last, state2 = wrapper(ys, state=state, predict_last=True)
    jax.block_until_ready((logits_last, state2))
    assert logits_last.shape == (B, 1, VOCAB), logits_last.shape

    ref_logits2, _ = _reference_forward(lm, ys, state)
    assert float(jnp.max(jnp.abs(logits_last - ref_logits2[:, -1:, :]))) < 2e-2

    print("KERNEL_OK")
</pallas_src>

<mosaic_0001>
module attributes {stable_mosaic.version = 11 : i64} {
  func.func @_matmul_bias_kernel(%arg0: i32, %arg1: i32, %arg2: i32, %arg3: memref<64x128xbf16, #tpu.memory_space<vmem>>, %arg4: memref<128x128xbf16, #tpu.memory_space<vmem>>, %arg5: memref<1x128xf32, #tpu.memory_space<vmem>>, %arg6: memref<64x128xf32, #tpu.memory_space<vmem>>, %arg7: memref<64x128xf32, #tpu.memory_space<vmem>>) attributes {dimension_semantics = [#tpu.dimension_semantics<parallel>, #tpu.dimension_semantics<parallel>, #tpu.dimension_semantics<arbitrary>], iteration_bounds = array<i64: 1, 1, 1>, scalar_prefetch = 0 : i64, scratch_operands = 1 : i64, tpu.core_type = #tpu.core_type<tc>, window_params = [{transform_indices = @transform_0, window_bounds = array<i64: 64, 128>}, {transform_indices = @transform_1, window_bounds = array<i64: 128, 128>}, {transform_indices = @transform_2, window_bounds = array<i64: 1, 128>}, {transform_indices = @transform_3, window_bounds = array<i64: 64, 128>}]} {
    %c0_i32 = arith.constant 0 : i32
    %0 = arith.cmpi eq, %arg2, %c0_i32 : i32
    %1 = arith.extui %0 : i1 to i32
    %c0_i32_0 = arith.constant 0 : i32
    %2 = arith.cmpi ne, %1, %c0_i32_0 : i32
    scf.if %2 {
      %cst_10 = arith.constant 0.000000e+00 : f32
      %12 = vector.broadcast %cst_10 : f32 to vector<64x128xf32>
      %c0_11 = arith.constant 0 : index
      %c0_12 = arith.constant 0 : index
      %13 = vector.load %arg7[%c0_11, %c0_12] : memref<64x128xf32, #tpu.memory_space<vmem>>, vector<64x128xf32>
      tpu.vector_store %arg7[%c0_11, %c0_12], %12 {strides = array<i32>} : memref<64x128xf32, #tpu.memory_space<vmem>>, vector<64x128xf32>,
    } else {
    }
    %c0 = arith.constant 0 : index
    %c0_1 = arith.constant 0 : index
    %3 = vector.load %arg7[%c0, %c0_1] : memref<64x128xf32, #tpu.memory_space<vmem>>, vector<64x128xf32>
    %c0_2 = arith.constant 0 : index
    %c0_3 = arith.constant 0 : index
    %4 = vector.load %arg3[%c0_2, %c0_3] : memref<64x128xbf16, #tpu.memory_space<vmem>>, vector<64x128xbf16>
    %c0_4 = arith.constant 0 : index
    %c0_5 = arith.constant 0 : index
    %5 = vector.load %arg4[%c0_4, %c0_5] : memref<128x128xbf16, #tpu.memory_space<vmem>>, vector<128x128xbf16>
    %cst = arith.constant dense<0.000000e+00> : vector<64x128xf32>
    %6 = tpu.matmul %4, %5, %cst {dimension_numbers = #tpu.dot_dimension_numbers<[1], [0], [0], [1], [0, 0, 1, 1], [], []>} : vector<64x128xbf16>, vector<128x128xbf16>, vector<64x128xf32> -> vector<64x128xf32>
    %7 = arith.addf %3, %6 : vector<64x128xf32>
    %c0_6 = arith.constant 0 : index
    %c0_7 = arith.constant 0 : index
    %8 = vector.load %arg7[%c0_6, %c0_7] : memref<64x128xf32, #tpu.memory_space<vmem>>, vector<64x128xf32>
    tpu.vector_store %arg7[%c0_6, %c0_7], %7 {strides = array<i32>} : memref<64x128xf32, #tpu.memory_space<vmem>>, vector<64x128xf32>,
    %c0_i32_8 = arith.constant 0 : i32
    %9 = arith.cmpi eq, %arg2, %c0_i32_8 : i32
    %10 = arith.extui %9 : i1 to i32
    %c0_i32_9 = arith.constant 0 : i32
    %11 = arith.cmpi ne, %10, %c0_i32_9 : i32
    scf.if %11 {
      %c0_10 = arith.constant 0 : index
      %c0_11 = arith.constant 0 : index
      %12 = vector.load %arg7[%c0_10, %c0_11] : memref<64x128xf32, #tpu.memory_space<vmem>>, vector<64x128xf32>
      %c0_12 = arith.constant 0 : index
      %c0_13 = arith.constant 0 : index
      %13 = vector.load %arg5[%c0_12, %c0_13] : memref<1x128xf32, #tpu.memory_space<vmem>>, vector<1x128xf32>
      %14 = vector.broadcast %13 : vector<1x128xf32> to vector<64x128xf32>
      %15 = arith.addf %12, %14 : vector<64x128xf32>
      %c0_14 = arith.constant 0 : index
      %c0_15 = arith.constant 0 : index
      %16 = vector.load %arg6[%c0_14, %c0_15] : memref<64x128xf32, #tpu.memory_space<vmem>>, vector<64x128xf32>
      tpu.vector_store %arg6[%c0_14, %c0_15], %15 {strides = array<i32>} : memref<64x128xf32, #tpu.memory_space<vmem>>, vector<64x128xf32>,
    } else {
    }
    return
  }
  func.func @transform_0(%arg0: i32, %arg1: i32, %arg2: i32) -> (i32, i32) {
    %c0_i32 = arith.constant 0 : i32
    return %arg0, %arg2 : i32, i32
  }
  func.func @transform_1(%arg0: i32, %arg1: i32, %arg2: i32) -> (i32, i32) {
    %c0_i32 = arith.constant 0 : i32
    return %arg2, %arg1 : i32, i32
  }
  func.func @transform_2(%arg0: i32, %arg1: i32, %arg2: i32) -> (i32, i32) {
    %c0_i32 = arith.constant 0 : i32
    %c0_i32_0 = arith.constant 0 : i32
    return %c0_i32, %arg1 : i32, i32
  }
  func.func @transform_3(%arg0: i32, %arg1: i32, %arg2: i32) -> (i32, i32) {
    %c0_i32 = arith.constant 0 : i32
    return %arg0, %arg1 : i32, i32
  }
}

</mosaic_0001>

<bundles_post_ra>
// kernel: tpu_custom_call.1
= control target key start
LH: loop header
LB: loop body
LE: loop exit
PB: predicated region body
PF: predicated region fallthrough
CT: control target
= control target key end

     0   :  { %8 = vsyncpa [#allocation4], 0  ;;  %s468_s0 = inlined_call_operand.hbm [shape: bf16[64,128], index: 0, kind: input, shape index: {}]   ;;  %s469_s1 = inlined_call_operand.hbm [shape: bf16[128,128], index: 1, kind: input, shape index: {}]   ;;  %s470_s2 = inlined_call_operand.vmem [shape: f32[1,128], index: 2, kind: input, shape index: {}]   ;;  %s471_s3 = inlined_call_operand.hbm [shape: f32[64,128], index: 3, kind: output, shape index: {}]  }
   0x1   :  { %9 = vsyncpa [#allocation7], 0 }
   0x2   :  { %10 = vsyncpa [#allocation5], 0  ;;  %s15_s14 = sshll.u32 %s468_s0, 4  ;;  %s429_s15 = smov [#allocation3]   ;;  %s16_s14 = int_to_ptr.hbm [resolvable:$true] %s15_s14 }
   0x3   :  { %s17_s16 = sshll.u32 %s429_s15, 4  ;;  %s28_s19 = sshll.u32 %s469_s1, 4  ;;  %s18_s16 = int_to_ptr.vmem [resolvable:$true] %s17_s16  ;;  %s29_s19 = int_to_ptr.hbm [resolvable:$true] %s28_s19 }
   0x4   :  { %s430_s20 = smov 64   ;;  %s431_s21 = smov 4  }
   0x5   :  { %23 = dma.hbm_to_vmem [thread:$0]  %s16_s14, 512, %s18_s16, [#allocation4], %s430_s20, %s430_s20, %s431_s21  }
   0x6   :  { %s432_s22 = smov [#allocation6]  }
   0x7   :  { %s30_s23 = sshll.u32 %s432_s22, 4  ;;  %s31_s23 = int_to_ptr.vmem [resolvable:$true] %s30_s23 }
   0x8   :  { %36 = dma.hbm_to_vmem [thread:$0]  %s29_s19, 1024, %s31_s23, [#allocation7], %s430_s20, %s430_s20, %s431_s21  }
   0x9   :  { %423 = dma.done.wait [#allocation4], 512  }
   0xa   :  { %424 = vsyncadd [#allocation4], 4294966784 }
   0xb   :  { %425 = dma.done.wait [#allocation7], 1024  }
   0xc   :  { %426 = vsyncadd [#allocation7], 4294966272  ;;  %v318_v0 = vld [vmem:[#allocation6 + $0x38] sm:$0xff]  ;;  %v317_v1 = vld [vmem:[#allocation6 + $0x30] sm:$0xff]  ;;  %s433_s24 = smov [#allocation8]   ;;  %s245_s27 = sshll.u32 %s471_s3, 4  ;;  %s246_s27 = int_to_ptr.hbm [resolvable:$true] %s245_s27 }
   0xd   :  { %163 = vmatpush.bf16.msra.mxu0 %v318_v0  ;;  %319 = vmatpush.bf16.msra.mxu1 %v318_v0  ;;  %v316_v2 = vld [vmem:[#allocation6 + $0x28] sm:$0xff]  ;;  %v315_v3 = vld [vmem:[#allocation6 + $0x20] sm:$0xff]  ;;  %v314_v4 = vld [vmem:[#allocation6 + $0x18] sm:$0xff]  ;;  %s434_s28 = smov 128   ;;  %s435_s29 = smov 8  }
   0xe   :  { %320 = vmatpush.bf16.msra.mxu2 %v318_v0  ;;  %321 = vmatpush.bf16.msra.mxu3 %v318_v0  ;;  %v313_v5 = vld [vmem:[#allocation6 + $0x10] sm:$0xff]  ;;  %v312_v6 = vld [vmem:[#allocation6 + $0x8] sm:$0xff]  ;;  %v311_v7 = vld [vmem:[#allocation6] sm:$0xff] }
   0xf   :  { %v307_v8 = vld [vmem:[#allocation3] sm:$0xff]  ;;  %v308_v9 = vld [vmem:[#allocation3 + $0x8] sm:$0xff]  ;;  %v309_v10 = vld [vmem:[#allocation3 + $0x10] sm:$0xff] }
  0x10   :  { %v310_v11 = vld [vmem:[#allocation3 + $0x18] sm:$0xff]  ;;  %v350_v12 = vld [vmem:[%s470_s2] ss:$0 sm:$0xff]  ;;  %s243_s2 = sshll.u32 %s433_s24, 4  ;;  %s244_s2 = int_to_ptr.vmem [resolvable:$true] %s243_s2 }
  0x11   :  { %164 = vmatpush.bf16.msra.mxu0 %v317_v1  ;;  %322 = vmatpush.bf16.msra.mxu1 %v317_v1 }
  0x12   :  { %323 = vmatpush.bf16.msra.mxu2 %v317_v1  ;;  %324 = vmatpush.bf16.msra.mxu3 %v317_v1 }
  0x15   :  { %165 = vmatpush.bf16.msra.mxu0 %v316_v2  ;;  %325 = vmatpush.bf16.msra.mxu1 %v316_v2 }
  0x16   :  { %326 = vmatpush.bf16.msra.mxu2 %v316_v2  ;;  %327 = vmatpush.bf16.msra.mxu3 %v316_v2 }
  0x19   :  { %166 = vmatpush.bf16.msra.mxu0 %v315_v3  ;;  %328 = vmatpush.bf16.msra.mxu1 %v315_v3 }
  0x1a   :  { %329 = vmatpush.bf16.msra.mxu2 %v315_v3  ;;  %330 = vmatpush.bf16.msra.mxu3 %v315_v3 }
  0x1d   :  { %167 = vmatpush.bf16.msra.mxu0 %v314_v4  ;;  %331 = vmatpush.bf16.msra.mxu1 %v314_v4 }
  0x1e   :  { %332 = vmatpush.bf16.msra.mxu2 %v314_v4  ;;  %333 = vmatpush.bf16.msra.mxu3 %v314_v4 }
  0x21   :  { %168 = vmatpush.bf16.msra.mxu0 %v313_v5  ;;  %334 = vmatpush.bf16.msra.mxu1 %v313_v5 }
  0x22   :  { %335 = vmatpush.bf16.msra.mxu2 %v313_v5  ;;  %336 = vmatpush.bf16.msra.mxu3 %v313_v5 }
  0x25   :  { %169 = vmatpush.bf16.msra.mxu0 %v312_v6  ;;  %337 = vmatpush.bf16.msra.mxu1 %v312_v6 }
  0x26   :  { %338 = vmatpush.bf16.msra.mxu2 %v312_v6  ;;  %339 = vmatpush.bf16.msra.mxu3 %v312_v6 }
  0x29   :  { %170 = vmatpush.bf16.msra.mxu0 %v311_v7  ;;  %340 = vmatpush.bf16.msra.mxu1 %v311_v7 }
  0x2a   :  { %341 = vmatpush.bf16.msra.mxu2 %v311_v7  ;;  %342 = vmatpush.bf16.msra.mxu3 %v311_v7 }
  0x2c   :  { %171 = vmatmul.bf16.vlgmr.msra.gmra.mxu0 %v307_v8  ;;  %176 = vmatmul.bf16.vlgmr.msra.gmra.mxu1 %v308_v9 }
  0x2d   :  { %181 = vmatmul.bf16.vlgmr.msra.gmra.mxu2 %v309_v10  ;;  %186 = vmatmul.bf16.vlgmr.msra.gmra.mxu3 %v310_v11 }
  0xa9   :  { %v172_v13 = vpop.f32.mrf.mxu0  ;;  %v177_v14 = vpop.f32.mrf.mxu1 }
  0xaa   :  { %v223_v15 = vadd.f32 %v350_v12, %v172_v13  ;;  %v225_v16 = vadd.f32 %v350_v12, %v177_v14 }
  0xac   :  { %231 = vst [vmem:[#allocation8] sm:$0xff] %v223_v15 }
  0xad   :  { %233 = vst [vmem:[#allocation8 + $0x10] sm:$0xff] %v225_v16 }
  0xb0   :  { %v182_v17 = vpop.f32.mrf.mxu2  ;;  %v187_v18 = vpop.f32.mrf.mxu3 }
  0xb1   :  { %v227_v19 = vadd.f32 %v350_v12, %v182_v17  ;;  %v229_v20 = vadd.f32 %v350_v12, %v187_v18  ;;  %v174_v21 = vpop.f32.mrf.mxu0  ;;  %v179_v22 = vpop.f32.mrf.mxu1 }
  0xb2   :  { %v224_v23 = vadd.f32 %v350_v12, %v174_v21  ;;  %v226_v24 = vadd.f32 %v350_v12, %v179_v22 }
  0xb3   :  { %235 = vst [vmem:[#allocation8 + $0x20] sm:$0xff] %v227_v19 }
  0xb4   :  { %237 = vst [vmem:[#allocation8 + $0x30] sm:$0xff] %v229_v20 }
  0xb5   :  { %232 = vst [vmem:[#allocation8 + $0x8] sm:$0xff] %v224_v23 }
  0xb6   :  { %234 = vst [vmem:[#allocation8 + $0x18] sm:$0xff] %v226_v24 }
  0xb8   :  { %v184_v25 = vpop.f32.mrf.mxu2  ;;  %v189_v26 = vpop.f32.mrf.mxu3 }
  0xb9   :  { %v228_v27 = vadd.f32 %v350_v12, %v184_v25  ;;  %v230_v28 = vadd.f32 %v350_v12, %v189_v26 }
  0xbb   :  { %236 = vst [vmem:[#allocation8 + $0x28] sm:$0xff] %v228_v27 }
  0xbc   :  { %238 = vst [vmem:[#allocation8 + $0x38] sm:$0xff] %v230_v28 }
  0xbd   :  { %251 = dma.vmem_to_hbm [thread:$0]  %s244_s2, 1024, %s246_s27, [#allocation5], %s434_s28, %s434_s28, %s435_s29  }
  0xbe   :  { %427 = dma.done.wait [#allocation5], 1024  }
  0xbf   :  { %428 = vsyncadd [#allocation5], 4294966272 }
  0xc0   :  { %256 = vsyncpa [#allocation4], 1 }
  0xc1   :  { %257 = vsyncpa [#allocation7], 1 }
  0xc2   :  { %258 = vsyncpa [#allocation5], 1 }

</bundles_post_ra>
